<compile_context>
chip_gen: v5e
topology: v5e:2x2
jax: 0.10.0
libtpu: 0.0.40
codegen_flags: <defaults>
</compile_context>

<pallas_src>
import jax
import jax.numpy as jnp
from jax import lax
from jax.experimental import pallas as pl
from jax.experimental.pallas import tpu as pltpu


def _round_up(x, m):
    return (x + m - 1) // m * m


def _vmem_capacity_bytes():
    """Physical VMEM per TensorCore (128 MiB v5e/v6e, 64 MiB v7x); safe fallback."""
    try:
        cap = getattr(pltpu.get_tpu_info(), "vmem_capacity_bytes", None)
        if cap:
            return int(cap)
    except Exception:
        pass
    return 64 * 1024 * 1024  # conservative (v7x per-TC)


# ------------------------------ Pallas kernel -------------------------------

def _attention_kernel(ctx_ref, emb_ref, len_ref, w_ref, b_ref, out_ref, attn_ref):
    ctx = ctx_ref[...]                                   # (TB, L, Din) f32
    w = w_ref[...]                                       # (1, Din)     f32
    b = b_ref[0, 0]                                      # scalar bias from SMEM

    tb, l = ctx.shape[0], ctx.shape[1]

    # fc(context).squeeze(-1): fused lane reduction (never hits HBM).
    logits = jnp.sum(ctx * w[None, :, :], axis=-1) + b   # (TB, L)

    # Length mask built in-kernel from the (TB, 1) int32 lengths column.
    col = lax.broadcasted_iota(jnp.int32, (tb, l), 1)    # (TB, L)
    mask = (col < len_ref[...]).astype(jnp.float32)      # (TB, L)

    # exp -> mask -> renormalize, exactly like the PyTorch reference.
    e = jnp.exp(logits) * mask                           # (TB, L)
    denom = jnp.sum(e, axis=-1, keepdims=True)           # (TB, 1)
    attn = e * pl.reciprocal(denom, approx=True)         # (TB, L)
    attn_ref[...] = attn

    # weighted_embedd = (embedding * attn[..., None]).sum(1)
    out_ref[...] = jnp.sum(emb_ref[...] * attn[:, :, None], axis=1)   # (TB, Demb)


# --------------------------------- wrapper ----------------------------------

def attention_forward(fc_w, fc_b, context, embedding, lang_len, *, max_block_b=512):
    """Fused Pallas implementation of Attention.forward.

    fc_w      : (1, input_dim)   -- torch nn.Linear(input_dim, 1).weight layout
    fc_b      : (1, 1)
    context   : (B, max_len, input_dim) float32
    embedding : (B, max_len, emb_dim)   float32
    lang_len  : (B,) int32
    returns   : (weighted_embedd (B, emb_dim), attn (B, max_len))
    """
    B, L, Din = context.shape
    Demb = embedding.shape[-1]

    # ---- generation-aware batch tile & VMEM budget ---------------------------
    cap = _vmem_capacity_bytes()
    vmem_limit = min((cap * 3) // 4, 96 * 1024 * 1024)   # 96 MiB v5e/v6e, 48 MiB v7x
    # Per-row VMEM: double-buffered ctx/emb/len/out tiles + materialized
    # element-wise temps (ctx*w and emb*attn products) inside the kernel body.
    stream_row = 4 * L * (Din + Demb) + 4
    temps_row = 4 * L * (Din + Demb)
    outs_row = 4 * (Demb + L)
    per_row = 2 * (stream_row + outs_row) + temps_row
    tb_budget = max(8, (int(vmem_limit * 0.8) // per_row) // 8 * 8)
    # Keep the grid >= 2 steps when B allows (both v7x TensorCores busy).
    tb_split = _round_up(pl.cdiv(B, 2), 8)
    TB = max(8, min(max_block_b, tb_budget, tb_split))

    grid = (pl.cdiv(B, TB),)                              # partial last block: no jnp.pad

    lens2d = lang_len.astype(jnp.int32).reshape(B, 1)

    cost = pl.CostEstimate(
        flops=2 * B * L * (Din + Demb),
        transcendentals=B * L + B,
        bytes_accessed=4 * (B * L * (Din + Demb) + B * (Demb + L) + B + Din + 1),
    )

    weighted, attn = pl.pallas_call(
        _attention_kernel,
        out_shape=(
            jax.ShapeDtypeStruct((B, Demb), jnp.float32),
            jax.ShapeDtypeStruct((B, L), jnp.float32),
        ),
        grid=grid,
        in_specs=[
            pl.BlockSpec((TB, L, Din), lambda i: (i, 0, 0)),    # context tile
            pl.BlockSpec((TB, L, Demb), lambda i: (i, 0, 0)),   # embedding tile
            pl.BlockSpec((TB, 1), lambda i: (i, 0)),            # lengths column (int32)
            pl.BlockSpec((1, Din), lambda i: (0, 0)),           # fc weight (grid-invariant)
            pl.BlockSpec(memory_space=pltpu.MemorySpace.SMEM),  # fc bias (scalar, SMEM)
        ],
        out_specs=(
            pl.BlockSpec((TB, Demb), lambda i: (i, 0)),         # lane-dense weighted emb
            pl.BlockSpec((TB, L), lambda i: (i, 0)),            # attention weights
        ),
        compiler_params=pltpu.CompilerParams(
            dimension_semantics=("parallel",),
            vmem_limit_bytes=vmem_limit,
        ),
        cost_estimate=cost,
    )(context, embedding, lens2d, fc_w, fc_b)

    return weighted, attn


# ------------------------------ pure-JAX check -------------------------------

def attention_ref(fc_w, fc_b, context, embedding, lang_len):
    B, L, _ = context.shape
    mask = (jnp.arange(L)[None, :] < lang_len[:, None]).astype(jnp.float32)
    logits = jnp.einsum('bld,od->bl', context, fc_w) + fc_b[0, 0]
    attn = jnp.exp(logits) * mask
    attn = attn / jnp.sum(attn, axis=1, keepdims=True)
    weighted = jnp.sum(embedding * attn[..., None], axis=1)
    return weighted, attn


# ----------------------------------- main ------------------------------------

if __name__ == "__main__":
    key = jax.random.PRNGKey(0)
    k1, k2, k3, k4 = jax.random.split(key, 4)

    B, L, Din, Demb = 2, 8, 256, 128
    s = 1.0 / (Din ** 0.5)
    fc_w = jax.random.uniform(k1, (1, Din), jnp.float32, -s, s)   # nn.Linear(Din, 1).weight
    fc_b = jax.random.uniform(k2, (1, 1), jnp.float32, -s, s)     # nn.Linear(Din, 1).bias
    context = jax.random.normal(k3, (B, L, Din), jnp.float32)
    embedding = jax.random.normal(k4, (B, L, Demb), jnp.float32)
    lang_len = jnp.array([8, 5], dtype=jnp.int32)

    weighted, attn = attention_forward(fc_w, fc_b, context, embedding, lang_len)
    weighted = jax.block_until_ready(weighted)
    attn = jax.block_until_ready(attn)

    assert weighted.shape == (B, Demb) and attn.shape == (B, L)
    assert bool(jnp.all(jnp.isfinite(weighted))) and bool(jnp.all(jnp.isfinite(attn)))

    w_ref, a_ref = attention_ref(fc_w, fc_b, context, embedding, lang_len)
    assert bool(jnp.allclose(weighted, w_ref, rtol=2e-2, atol=1e-3))
    assert bool(jnp.allclose(attn, a_ref, rtol=2e-2, atol=1e-3))

    print("KERNEL_OK")
</pallas_src>

<mosaic_0001>
module attributes {stable_mosaic.version = 11 : i64} {
  func.func @_attention_kernel(%arg0: i32, %arg1: memref<8x8x256xf32, #tpu.memory_space<vmem>>, %arg2: memref<8x8x128xf32, #tpu.memory_space<vmem>>, %arg3: memref<8x1xi32, #tpu.memory_space<vmem>>, %arg4: memref<1x256xf32, #tpu.memory_space<vmem>>, %arg5: memref<1x1xf32, #tpu.memory_space<smem>>, %arg6: memref<8x128xf32, #tpu.memory_space<vmem>>, %arg7: memref<8x8xf32, #tpu.memory_space<vmem>>) attributes {dimension_semantics = [#tpu.dimension_semantics<parallel>], iteration_bounds = array<i64: 1>, scalar_prefetch = 0 : i64, scratch_operands = 0 : i64, tpu.core_type = #tpu.core_type<tc>, window_params = [{transform_indices = @transform_0, window_bounds = array<i64: 8, 8, 256>}, {transform_indices = @transform_1, window_bounds = array<i64: 8, 8, 128>}, {transform_indices = @transform_2, window_bounds = array<i64: 8, 1>}, {pipeline_mode = #tpu.pipeline_mode<synchronous>, transform_indices = @transform_3, window_bounds = array<i64: 1, 256>}, {transform_indices = @transform_4, window_bounds = array<i64: 1, 1>}, {transform_indices = @transform_5, window_bounds = array<i64: 8, 128>}, {transform_indices = @transform_6, window_bounds = array<i64: 8, 8>}]} {
    %c0 = arith.constant 0 : index
    %c0_0 = arith.constant 0 : index
    %c0_1 = arith.constant 0 : index
    %0 = vector.load %arg1[%c0, %c0_0, %c0_1] : memref<8x8x256xf32, #tpu.memory_space<vmem>>, vector<8x8x256xf32>
    %c0_2 = arith.constant 0 : index
    %c0_3 = arith.constant 0 : index
    %1 = vector.load %arg4[%c0_2, %c0_3] : memref<1x256xf32, #tpu.memory_space<vmem>>, vector<1x256xf32>
    %c0_4 = arith.constant 0 : index
    %c0_5 = arith.constant 0 : index
    %2 = memref.load %arg5[%c0_4, %c0_5] : memref<1x1xf32, #tpu.memory_space<smem>>
    %3 = vector.shape_cast %1 : vector<1x256xf32> to vector<1x1x256xf32>
    %4 = vector.broadcast %3 : vector<1x1x256xf32> to vector<8x8x256xf32>
    %5 = arith.mulf %0, %4 : vector<8x8x256xf32>
    %cst = arith.constant dense<0.000000e+00> : vector<8x8xf32>
    %6 = vector.multi_reduction <add>, %5, %cst [2] : vector<8x8x256xf32> to vector<8x8xf32>
    %7 = vector.broadcast %2 : f32 to vector<8x8xf32>
    %8 = arith.addf %6, %7 : vector<8x8xf32>
    %9 = tpu.iota {dimensions = array<i32: 1>} : vector<8x8xi32>
    %c0_6 = arith.constant 0 : index
    %c0_7 = arith.constant 0 : index
    %10 = vector.load %arg3[%c0_6, %c0_7] : memref<8x1xi32, #tpu.memory_space<vmem>>, vector<8x1xi32>
    %11 = vector.broadcast %10 : vector<8x1xi32> to vector<8x8xi32>
    %12 = arith.cmpi slt, %9, %11 : vector<8x8xi32>
    %13 = arith.extui %12 : vector<8x8xi1> to vector<8x8xi32>
    %14 = arith.sitofp %13 : vector<8x8xi32> to vector<8x8xf32>
    %15 = math.exp %8 : vector<8x8xf32>
    %16 = arith.mulf %15, %14 : vector<8x8xf32>
    %cst_8 = arith.constant dense<0.000000e+00> : vector<8xf32>
    %17 = vector.multi_reduction <add>, %16, %cst_8 [1] : vector<8x8xf32> to vector<8xf32>
    %18 = vector.shape_cast %17 : vector<8xf32> to vector<8x1xf32>
    %19 = tpu.reciprocal %18 {approx = true} : vector<8x1xf32> -> vector<8x1xf32>
    %20 = vector.broadcast %19 : vector<8x1xf32> to vector<8x8xf32>
    %21 = arith.mulf %16, %20 : vector<8x8xf32>
    %c0_9 = arith.constant 0 : index
    %c0_10 = arith.constant 0 : index
    %22 = vector.load %arg7[%c0_9, %c0_10] : memref<8x8xf32, #tpu.memory_space<vmem>>, vector<8x8xf32>
    tpu.vector_store %arg7[%c0_9, %c0_10], %21 {strides = array<i32>} : memref<8x8xf32, #tpu.memory_space<vmem>>, vector<8x8xf32>,
    %c0_11 = arith.constant 0 : index
    %c0_12 = arith.constant 0 : index
    %c0_13 = arith.constant 0 : index
    %23 = vector.load %arg2[%c0_11, %c0_12, %c0_13] : memref<8x8x128xf32, #tpu.memory_space<vmem>>, vector<8x8x128xf32>
    %24 = vector.shape_cast %21 : vector<8x8xf32> to vector<8x8x1xf32>
    %25 = vector.broadcast %24 : vector<8x8x1xf32> to vector<8x8x128xf32>
    %26 = arith.mulf %23, %25 : vector<8x8x128xf32>
    %cst_14 = arith.constant dense<0.000000e+00> : vector<8x128xf32>
    %27 = vector.multi_reduction <add>, %26, %cst_14 [1] : vector<8x8x128xf32> to vector<8x128xf32>
    %c0_15 = arith.constant 0 : index
    %c0_16 = arith.constant 0 : index
    %28 = vector.load %arg6[%c0_15, %c0_16] : memref<8x128xf32, #tpu.memory_space<vmem>>, vector<8x128xf32>
    tpu.vector_store %arg6[%c0_15, %c0_16], %27 {strides = array<i32>} : memref<8x128xf32, #tpu.memory_space<vmem>>, vector<8x128xf32>,
    return
  }
  func.func @transform_0(%arg0: i32) -> (i32, i32, i32) {
    %c0_i32 = arith.constant 0 : i32
    %c0_i32_0 = arith.constant 0 : i32
    %c0_i32_1 = arith.constant 0 : i32
    return %arg0, %c0_i32, %c0_i32_0 : i32, i32, i32
  }
  func.func @transform_1(%arg0: i32) -> (i32, i32, i32) {
    %c0_i32 = arith.constant 0 : i32
    %c0_i32_0 = arith.constant 0 : i32
    %c0_i32_1 = arith.constant 0 : i32
    return %arg0, %c0_i32, %c0_i32_0 : i32, i32, i32
  }
  func.func @transform_2(%arg0: i32) -> (i32, i32) {
    %c0_i32 = arith.constant 0 : i32
    %c0_i32_0 = arith.constant 0 : i32
    return %arg0, %c0_i32 : i32, i32
  }
  func.func @transform_3(%arg0: i32) -> (i32, i32) {
    %c0_i32 = arith.constant 0 : i32
    %c0_i32_0 = arith.constant 0 : i32
    %c0_i32_1 = arith.constant 0 : i32
    return %c0_i32, %c0_i32_0 : i32, i32
  }
  func.func @transform_4(%arg0: i32) -> (i32, i32) {
    %c0_i32 = arith.constant 0 : i32
    %c0_i32_0 = arith.constant 0 : i32
    %c0_i32_1 = arith.constant 0 : i32
    return %c0_i32, %c0_i32_0 : i32, i32
  }
  func.func @transform_5(%arg0: i32) -> (i32, i32) {
    %c0_i32 = arith.constant 0 : i32
    %c0_i32_0 = arith.constant 0 : i32
    return %arg0, %c0_i32 : i32, i32
  }
  func.func @transform_6(%arg0: i32) -> (i32, i32) {
    %c0_i32 = arith.constant 0 : i32
    %c0_i32_0 = arith.constant 0 : i32
    return %arg0, %c0_i32 : i32, i32
  }
}

</mosaic_0001>

<bundles_post_ra>
// kernel: tpu_custom_call.1
= control target key start
LH: loop header
LB: loop body
LE: loop exit
PB: predicated region body
PF: predicated region fallthrough
CT: control target
= control target key end

     0   :  { %13 = vsyncpa [#allocation4], 0  ;;  %s784_s0 = inlined_call_operand.hbm [shape: f32[2,8,256], index: 0, kind: input, shape index: {}]   ;;  %s785_s1 = inlined_call_operand.hbm [shape: f32[2,8,128], index: 1, kind: input, shape index: {}]   ;;  %s786_s2 = inlined_call_operand.vmem [shape: s32[2,1], index: 2, kind: input, shape index: {}]   ;;  %s787_s3 = inlined_call_operand.vmem [shape: f32[1,256], index: 3, kind: input, shape index: {}]   ;;  %s788_s4 = inlined_call_operand.<no memory space> [shape: f32[1,1], index: 4, kind: input, shape index: {}]   ;;  %s789_s5 = inlined_call_operand.hbm [shape: f32[2,128], index: 5, kind: output, shape index: {0}]   ;;  %s790_s6 = inlined_call_operand.hbm [shape: f32[2,8], index: 6, kind: output, shape index: {1}]  }
   0x1   :  { %14 = vsyncpa [#allocation7], 0 }
   0x2   :  { %15 = vsyncpa [#allocation5], 0 }
   0x3   :  { %16 = vsyncpa [#allocation10], 0 }
   0x4   :  { %20 = vsyncadd [#allocation4], 1536  ;;  %s21_s23 = sshll.u32 %s784_s0, 4  ;;  %s650_s24 = smov [#allocation3]   ;;  %s22_s23 = int_to_ptr.hbm [resolvable:$true] %s21_s23 }
   0x5   :  { %s23_s25 = sshll.u32 %s650_s24, 4  ;;  %s651_s26 = smov 256   ;;  %s24_s25 = int_to_ptr.vmem [resolvable:$true] %s23_s25 }
   0x6   :  { %s652_s27 = smov 16  }
   0x7   :  { %29 = dma.hbm_to_vmem [thread:$0]  %s22_s23, 512, %s24_s25, [#allocation4], %s651_s26, %s651_s26, %s652_s27  }
   0x8   :  { %33 = vsyncadd [#allocation7], 768  ;;  %s34_s30 = sshll.u32 %s785_s1, 4  ;;  %s653_s7 = smov [#allocation6]   ;;  %s35_s30 = int_to_ptr.hbm [resolvable:$true] %s34_s30 }
   0x9   :  { %s36_s8 = sshll.u32 %s653_s7, 4  ;;  %s654_s9 = smov 128   ;;  %s37_s8 = int_to_ptr.vmem [resolvable:$true] %s36_s8 }
   0xa   :  { %s655_s10 = smov 8  }
   0xb   :  { %42 = dma.hbm_to_vmem [thread:$0]  %s35_s30, 256, %s37_s8, [#allocation7], %s654_s9, %s654_s9, %s655_s10  }
   0xc   :  { %642 = dma.done.wait [#allocation4], 2048  }
   0xd   :  { %643 = vsyncadd [#allocation4], 4294965248 }
   0xe   :  { %644 = dma.done.wait [#allocation7], 1024  }
   0xf   :  { %645 = vsyncadd [#allocation7], 4294966272  ;;  %v656_v0 = vmov 0   ;;  %v131_v1 = vld [vmem:[%s786_s2] sm:$0xff]  ;;  %v63_v2 = vld [vmem:[#allocation3 + $0x30] sm:$0xff]  ;;  %v129_v23 = vlaneseq  ;;  %v657_v49 = vmov 0.0  }
  0x10   :  { %501 = vset.pattern.permute.xlu0 %v656_v0  ;;  %v64_v3 = vld [vmem:[#allocation3 + $0x38] sm:$0xff]  ;;  %v73_v4 = vld [vmem:[%s787_s3] sm:$0x3]  ;;  %v59_v5 = vld [vmem:[#allocation3 + $0x10] sm:$0xff]  ;;  %vm267_vm1 = vcmask 1041409   ;;  %vm269_vm2 = vcmask 1042434  }
  0x11   :  { %133 = vperm.xlu0 %501, %v131_v1   ;;  %v60_v6 = vld [vmem:[#allocation3 + $0x18] sm:$0xff]  ;;  %v76_v7 = vperm.slane %v73_v4, 0  ;;  %v77_v8 = vperm.slane %v73_v4, 1  ;;  %v65_v13 = vld [vmem:[#allocation3 + $0x40] sm:$0xff]  ;;  %v66_v14 = vld [vmem:[#allocation3 + $0x48] sm:$0xff]  ;;  %v157_v30 = vshrl.u32 %v129_v23, 7 }
  0x12   :  { %v61_v15 = vld [vmem:[#allocation3 + $0x20] sm:$0xff]  ;;  %v62_v16 = vld [vmem:[#allocation3 + $0x28] sm:$0xff]  ;;  %v67_v28 = vld [vmem:[#allocation3 + $0x50] sm:$0xff]  ;;  %v710_v47 = vand.u32 127, %v129_v23  ;;  %vm271_vm3 = vcmask 1043459   ;;  %vm273_vm4 = vcmask 1044484  }
  0x13   :  { %v86_v9 = vmul.f32 %v76_v7, %v63_v2  ;;  %v87_v10 = vmul.f32 %v77_v8, %v64_v3  ;;  %v82_v11 = vmul.f32 %v76_v7, %v59_v5  ;;  %v83_v12 = vmul.f32 %v77_v8, %v60_v6  ;;  %v69_v26 = vld [vmem:[#allocation3 + $0x60] sm:$0xff]  ;;  %v70_v27 = vld [vmem:[#allocation3 + $0x68] sm:$0xff]  ;;  %v68_v29 = vld [vmem:[#allocation3 + $0x58] sm:$0xff]  ;;  %508 = vset.pattern.permute.xlu1 %v157_v30 }
  0x14   :  { %v88_v19 = vmul.f32 %v76_v7, %v65_v13  ;;  %v89_v20 = vmul.f32 %v77_v8, %v66_v14  ;;  %v84_v21 = vmul.f32 %v76_v7, %v61_v15  ;;  %v85_v22 = vmul.f32 %v77_v8, %v62_v16  ;;  %502 = vset.pattern.permute.xlu2 %v157_v30  ;;  %v71_v37 = vld [vmem:[#allocation3 + $0x70] sm:$0xff]  ;;  %v72_v38 = vld [vmem:[#allocation3 + $0x78] sm:$0xff]  ;;  %v57_v42 = vld [vmem:[#allocation3] sm:$0xff] }
  0x15   :  { %v105_v17 = vadd.f32 %v87_v10, %v86_v9  ;;  %v99_v18 = vadd.f32 %v83_v12, %v82_v11  ;;  %v92_v31 = vmul.f32 %v76_v7, %v69_v26  ;;  %v93_v32 = vmul.f32 %v77_v8, %v70_v27  ;;  %v58_v43 = vld [vmem:[#allocation3 + $0x8] sm:$0xff] }
  0x16   :  { %v108_v24 = vadd.f32 %v89_v20, %v88_v19  ;;  %v102_v25 = vadd.f32 %v85_v22, %v84_v21  ;;  %v90_v33 = vmul.f32 %v76_v7, %v67_v28  ;;  %v91_v34 = vmul.f32 %v77_v8, %v68_v29 }
  0x17   :  { %106 = vadd.xlane.f32.xlu2 %v105_v17  ;;  %100 = vadd.xlane.f32.xlu1 %v99_v18  ;;  %v114_v35 = vadd.f32 %v93_v32, %v92_v31  ;;  %v94_v39 = vmul.f32 %v76_v7, %v71_v37  ;;  %v95_v40 = vmul.f32 %v77_v8, %v72_v38  ;;  %v120_v3 = vstv %s788_s4 }
  0x18   :  { %v111_v36 = vadd.f32 %v91_v34, %v90_v33  ;;  %v80_v44 = vmul.f32 %v76_v7, %v57_v42  ;;  %v81_v45 = vmul.f32 %v77_v8, %v58_v43  ;;  %vm275_vm5 = vcmask 1045509  }
  0x19   :  { %519 = vset.pattern.permute.xlu0 %v157_v30  ;;  %v117_v41 = vadd.f32 %v95_v40, %v94_v39  ;;  %vm277_vm6 = vcmask 1046534   ;;  %vm279_vm7 = vcmask 1047559   ;;  %vm282_vm8 = vcmask 64512  }
  0x1a   :  { %v96_v46 = vadd.f32 %v81_v45, %v80_v44 }
  0x1f   :  { %109 = vadd.xlane.f32.xlu2 %v108_v24  ;;  %103 = vadd.xlane.f32.xlu1 %v102_v25 }
  0x27   :  { %115 = vadd.xlane.f32.xlu2 %v114_v35  ;;  %112 = vadd.xlane.f32.xlu1 %v111_v36 }
  0x2f   :  { %118 = vadd.xlane.f32.xlu1 %v117_v41 }
  0x3b   :  { %97 = vadd.xlane.f32.xlu0 %v96_v46 }
  0x83   :  { %v134_v48 = vpop.permute.xlu0 %133 }
  0x84   :  { %vm135_vm0 = vcmp.lt.s32.totalorder %v710_v47, %v134_v48 }
  0x85   :  { %v488_v50 = vsel %vm135_vm0, 1.0, %v657_v49 }
  0x86   :  { %v155_v51 = vperm.slane %v488_v50, 0  ;;  %v162_v52 = vperm.slane %v488_v50, 1  ;;  %v169_v53 = vperm.slane %v488_v50, 2  ;;  %v176_v54 = vperm.slane %v488_v50, 3 }
  0x87   :  { %v197_v55 = vperm.slane %v488_v50, 6  ;;  %v204_v56 = vperm.slane %v488_v50, 7  ;;  %v183_v60 = vperm.slane %v488_v50, 4  ;;  %v190_v61 = vperm.slane %v488_v50, 5 }
  0x88   :  { %v503_v57 = vpack.i.bf16 %v162_v52, %v155_v51  ;;  %v509_v58 = vpack.i.bf16 %v176_v54, %v169_v53 }
  0x89   :  { %v520_v59 = vpack.i.bf16 %v204_v56, %v197_v55  ;;  %v514_v62 = vpack.i.bf16 %v190_v61, %v183_v60 }
  0x8a   :  { %504 = vperm.xlu2 %502, %v503_v57   ;;  %510 = vperm.xlu1 %508, %v509_v58   ;;  %v107_v63 = vpop.xlane.xlu2 %106  ;;  %v101_v4 = vpop.xlane.xlu1 %100 }
  0x8b   :  { %521 = vperm.xlu0 %519, %v520_v59   ;;  %v122_v6 = vadd.f32 %v120_v3, %v101_v4  ;;  %v124_v18 = vadd.f32 %v120_v3, %v107_v63 }
  0x8d   :  { %v140_v9 = vmul.f32 1.442695, %v122_v6  ;;  %v144_v20 = vmul.f32 1.442695, %v124_v18 }
  0x92   :  { %515 = vperm.xlu2 %502, %v514_v62   ;;  %526 = vset.pattern.permute.xlu1 %v656_v0  ;;  %v110_v1 = vpop.xlane.xlu2 %109  ;;  %v104_v10 = vpop.xlane.xlu1 %103 }
  0x93   :  { %527 = vset.pattern.permute.xlu0 %v656_v0  ;;  %v123_v19 = vadd.f32 %v120_v3, %v104_v10  ;;  %v125_v23 = vadd.f32 %v120_v3, %v110_v1 }
  0x95   :  { %v142_v21 = vmul.f32 1.442695, %v123_v19  ;;  %v146_v25 = vmul.f32 1.442695, %v125_v23 }
  0x9a   :  { %525 = vset.pattern.permute.xlu2 %v656_v0  ;;  %v116_v8 = vpop.xlane.xlu2 %115  ;;  %v113_v17 = vpop.xlane.xlu1 %112 }
  0x9b   :  { %v126_v24 = vadd.f32 %v120_v3, %v113_v17  ;;  %v127_v32 = vadd.f32 %v120_v3, %v116_v8 }
  0x9d   :  { %v148_v26 = vmul.f32 1.442695, %v126_v24  ;;  %v150_v37 = vmul.f32 1.442695, %v127_v32 }
  0xa2   :  { %v119_v22 = vpop.xlane.xlu1 %118 }
  0xa3   :  { %v128_v35 = vadd.f32 %v120_v3, %v119_v22 }
  0xa5   :  { %v152_v41 = vmul.f32 1.442695, %v128_v35  ;;  %v362_v35 = vld [vmem:[#allocation6 + $0x8] sm:$0xff] }
  0xae   :  { %v98_v2 = vpop.xlane.xlu0 %97 }
  0xaf   :  { %v121_v5 = vadd.f32 %v120_v3, %v98_v2 }
  0xb1   :  { %v138_v7 = vmul.f32 1.442695, %v121_v5 }
  0xb3   :  { %528 = vpow2.f32 %v138_v7 }
  0xb4   :  { %530 = vpow2.f32 %v140_v9 }
  0xb5   :  { %532 = vpow2.f32 %v144_v20 }
  0xb6   :  { %534 = vpow2.f32 %v142_v21 }
  0xb7   :  { %536 = vpow2.f32 %v146_v25 }
  0xb8   :  { %538 = vpow2.f32 %v148_v26 }
  0xb9   :  { %v529_v11 = vpop.eup %528  ;;  %540 = vpow2.f32 %v150_v37 }
  0xba   :  { %v531_v14 = vpop.eup %530  ;;  %542 = vpow2.f32 %v152_v41 }
  0xbb   :  { %v533_v28 = vpop.eup %532 }
  0xbc   :  { %v535_v31 = vpop.eup %534 }
  0xbd   :  { %v537_v40 = vpop.eup %536 }
  0xbe   :  { %v539_v42 = vpop.eup %538 }
  0xbf   :  { %v541_v49 = vpop.eup %540 }
  0xc0   :  { %v543_v50 = vpop.eup %542 }
  0xe4   :  { %v505_v12 = vpop.permute.xlu2 %504 }
  0xe5   :  { %v507_v13 = vunpack.i.h.bf16 %v505_v12  ;;  %v506_v0 = vunpack.i.l.bf16 %v505_v12 }
  0xe7   :  { %v719_v15 = vmul.f32 %v529_v11, %v506_v0  ;;  %v721_v16 = vmul.f32 %v531_v14, %v507_v13 }
  0xe9   :  { %239 = vperm.xlu1 %526, %v721_v16   ;;  %236 = vperm.xlu2 %525, %v719_v15  }
  0xec   :  { %v516_v36 = vpop.permute.xlu2 %515 }
  0xed   :  { %v518_v38 = vunpack.i.h.bf16 %v516_v36  ;;  %v517_v39 = vunpack.i.l.bf16 %v516_v36  ;;  %v363_v36 = vld [vmem:[#allocation6 + $0x10] sm:$0xff] }
  0xef   :  { %v223_v43 = vmul.f32 %v537_v40, %v517_v39  ;;  %v731_v44 = vmul.f32 %v539_v42, %v518_v38 }
  0xfc   :  { %v511_v27 = vpop.permute.xlu1 %510 }
  0xfd   :  { %v513_v29 = vunpack.i.h.bf16 %v511_v27  ;;  %v512_v30 = vunpack.i.l.bf16 %v511_v27  ;;  %v522_v45 = vpop.permute.xlu0 %521 }
  0xfe   :  { %v524_v46 = vunpack.i.h.bf16 %v522_v45  ;;  %v523_v48 = vunpack.i.l.bf16 %v522_v45 }
  0xff   :  { %v725_v33 = vmul.f32 %v533_v28, %v513_v29  ;;  %v727_v34 = vmul.f32 %v535_v31, %v512_v30 }
 0x100   :  { %v226_v51 = vmul.f32 %v543_v50, %v524_v46  ;;  %v225_v52 = vmul.f32 %v541_v49, %v523_v48  ;;  %v364_v46 = vld [vmem:[#allocation6 + $0x18] sm:$0xff] }
 0x101   :  { %245 = vperm.xlu1 %526, %v725_v33   ;;  %242 = vperm.xlu2 %525, %v727_v34  }
 0x109   :  { %251 = vperm.xlu1 %526, %v731_v44   ;;  %248 = vperm.xlu2 %525, %v223_v43  }
 0x111   :  { %257 = vperm.xlu1 %526, %v226_v51   ;;  %254 = vperm.xlu2 %525, %v225_v52  }
 0x143   :  { %v237_v53 = vpop.permute.xlu2 %236 }
 0x144   :  { %v259_v59 = vperm.slane %v237_v53, %v710_v47 }
 0x15b   :  { %v240_v54 = vpop.permute.xlu1 %239  ;;  %v243_v55 = vpop.permute.xlu2 %242 }
 0x15c   :  { %v260_v57 = vperm.slane %v240_v54, %v710_v47  ;;  %v261_v60 = vperm.slane %v243_v55, %v710_v47 }
 0x15e   :  { %v268_v61 = vsel %vm267_vm1, %v260_v57, %v259_v59 }
 0x15f   :  { %v270_v1 = vsel %vm269_vm2, %v261_v60, %v268_v61 }
 0x163   :  { %v249_v58 = vpop.permute.xlu2 %248 }
 0x164   :  { %v263_v4 = vperm.slane %v249_v58, %v710_v47 }
 0x16b   :  { %v255_v5 = vpop.permute.xlu2 %254 }
 0x16c   :  { %v265_v8 = vperm.slane %v255_v5, %v710_v47 }
 0x173   :  { %v246_v56 = vpop.permute.xlu1 %245 }
 0x174   :  { %v262_v62 = vperm.slane %v246_v56, %v710_v47 }
 0x176   :  { %v272_v2 = vsel %vm271_vm3, %v262_v62, %v270_v1 }
 0x177   :  { %v274_v6 = vsel %vm273_vm4, %v263_v4, %v272_v2  ;;  %v366_v2 = vld [vmem:[#allocation6 + $0x28] sm:$0xff] }
 0x17b   :  { %v252_v63 = vpop.permute.xlu1 %251 }
 0x17c   :  { %v264_v3 = vperm.slane %v252_v63, %v710_v47 }
 0x17e   :  { %v276_v7 = vsel %vm275_vm5, %v264_v3, %v274_v6 }
 0x17f   :  { %v278_v11 = vsel %vm277_vm6, %v265_v8, %v276_v7 }
 0x183   :  { %v258_v9 = vpop.permute.xlu1 %257 }
 0x184   :  { %v266_v10 = vperm.slane %v258_v9, %v710_v47 }
 0x186   :  { %v280_v12 = vsel %vm279_vm7, %v266_v10, %v278_v11 }
 0x187   :  { %v283_v13 = vsel %vm282_vm8, %v280_v12, 0.0 }
 0x188   :  { %284 = vadd.xlane.f32.xlu2 %v283_v13 }
 0x1fb   :  { %v285_v0 = vpop.xlane.xlu2 %284 }
 0x1fc   :  { %544 = vrcp.f32 %v285_v0 }
 0x202   :  { %v545_v14 = vpop.eup %544 }
 0x203   :  { %v289_v17 = vperm.slane %v545_v14, 1  ;;  %v288_v18 = vperm.slane %v545_v14, 0  ;;  %v292_v21 = vperm.slane %v545_v14, 4  ;;  %v290_v22 = vperm.slane %v545_v14, 2 }
 0x204   :  { %v294_v25 = vperm.slane %v545_v14, 6  ;;  %v291_v26 = vperm.slane %v545_v14, 3  ;;  %v293_v29 = vperm.slane %v545_v14, 5 }
 0x205   :  { %v305_v19 = vmul.f32 %v289_v17, %v721_v16  ;;  %v304_v20 = vmul.f32 %v288_v18, %v719_v15  ;;  %v308_v23 = vmul.f32 %v292_v21, %v223_v43  ;;  %v306_v24 = vmul.f32 %v290_v22, %v727_v34  ;;  %v361_v34 = vld [vmem:[#allocation6] sm:$0xff] }
 0x206   :  { %v310_v27 = vmul.f32 %v294_v25, %v225_v52  ;;  %v307_v28 = vmul.f32 %v291_v26, %v725_v33  ;;  %v309_v16 = vmul.f32 %v293_v29, %v731_v44  ;;  %v295_v15 = vperm.slane %v545_v14, 7  ;;  %v365_v43 = vld [vmem:[#allocation6 + $0x20] sm:$0xff] }
 0x207   :  { %324 = vperm.xlu0 %527, %v305_v19   ;;  %321 = vperm.xlu1 %526, %v304_v20  }
 0x208   :  { %v311_v30 = vmul.f32 %v295_v15, %v226_v51  ;;  %v367_v51 = vld [vmem:[#allocation6 + $0x30] sm:$0xff] }
 0x20f   :  { %333 = vperm.xlu0 %527, %v308_v23   ;;  %327 = vperm.xlu1 %526, %v306_v24  }
 0x217   :  { %339 = vperm.xlu0 %527, %v310_v27   ;;  %330 = vperm.xlu1 %526, %v307_v28   ;;  %v368_v27 = vld [vmem:[#allocation6 + $0x38] sm:$0xff] }
 0x21f   :  { %336 = vperm.xlu1 %526, %v309_v16  }
 0x227   :  { %342 = vperm.xlu1 %526, %v311_v30  }
 0x279   :  { %v325_v31 = vpop.permute.xlu0 %324  ;;  %v322_v32 = vpop.permute.xlu1 %321 }
 0x27a   :  { %v378_v37 = vmul.f32 %v362_v35, %v325_v31  ;;  %v377_v40 = vmul.f32 %v361_v34, %v322_v32  ;;  %v345_v59 = vperm.slane %v325_v31, %v710_v47  ;;  %v344_v60 = vperm.slane %v322_v32, %v710_v47 }
 0x27c   :  { %v391_v33 = vrot.slane %v378_v37, 4  ;;  %v385_v42 = vrot.slane %v377_v40, 4  ;;  %v352_v9 = vsel %vm267_vm1, %v345_v59, %v344_v60 }
 0x27e   :  { %v392_v44 = vadd.f32 %v391_v33, %v378_v37  ;;  %v386_v50 = vadd.f32 %v385_v42, %v377_v40 }
 0x280   :  { %v393_v55 = vrot.slane %v392_v44, 2  ;;  %v387_v61 = vrot.slane %v386_v50, 2 }
 0x281   :  { %v334_v38 = vpop.permute.xlu0 %333  ;;  %v328_v39 = vpop.permute.xlu1 %327 }
 0x282   :  { %v379_v41 = vmul.f32 %v363_v36, %v328_v39  ;;  %v381_v48 = vmul.f32 %v365_v43, %v334_v38  ;;  %v346_v62 = vperm.slane %v328_v39, %v710_v47  ;;  %v394_v4 = vadd.f32 %v393_v55, %v392_v44 }
 0x283   :  { %v388_v10 = vadd.f32 %v387_v61, %v386_v50  ;;  %v348_v20 = vperm.slane %v334_v38, %v710_v47 }
 0x284   :  { %v397_v45 = vrot.slane %v379_v41, 4  ;;  %v409_v56 = vrot.slane %v381_v48, 4  ;;  %v353_v12 = vsel %vm269_vm2, %v346_v62, %v352_v9  ;;  %v395_v19 = vrot.slane %v394_v4, 1 }
 0x285   :  { %v389_v23 = vrot.slane %v388_v10, 1 }
 0x286   :  { %v398_v53 = vadd.f32 %v397_v45, %v379_v41  ;;  %v410_v5 = vadd.f32 %v409_v56, %v381_v48  ;;  %v396_v15 = vadd.f32 %v395_v19, %v394_v4 }
 0x287   :  { %v390_v34 = vadd.f32 %v389_v23, %v388_v10 }
 0x288   :  { %v399_v63 = vrot.slane %v398_v53, 2  ;;  %v411_v21 = vrot.slane %v410_v5, 2 }
 0x289   :  { %v331_v49 = vpop.permute.xlu1 %330  ;;  %v340_v52 = vpop.permute.xlu0 %339  ;;  %v441_v44 = vsel %vm267_vm1, %v396_v15, %v390_v34 }
 0x28a   :  { %v380_v54 = vmul.f32 %v364_v46, %v331_v49  ;;  %v383_v57 = vmul.f32 %v367_v51, %v340_v52  ;;  %v347_v3 = vperm.slane %v331_v49, %v710_v47  ;;  %v400_v13 = vadd.f32 %v399_v63, %v398_v53 }
 0x28b   :  { %v412_v30 = vadd.f32 %v411_v21, %v410_v5  ;;  %v350_v31 = vperm.slane %v340_v52, %v710_v47 }
 0x28c   :  { %v403_v58 = vrot.slane %v380_v54, 4  ;;  %v421_v6 = vrot.slane %v383_v57, 4  ;;  %v354_v0 = vsel %vm271_vm3, %v347_v3, %v353_v12  ;;  %v401_v25 = vrot.slane %v400_v13, 1 }
 0x28d   :  { %v355_v26 = vsel %vm273_vm4, %v348_v20, %v354_v0  ;;  %v413_v45 = vrot.slane %v412_v30, 1 }
 0x28e   :  { %v404_v1 = vadd.f32 %v403_v58, %v380_v54  ;;  %v422_v22 = vadd.f32 %v421_v6, %v383_v57  ;;  %v402_v39 = vadd.f32 %v401_v25, %v400_v13 }
 0x28f   :  { %v414_v52 = vadd.f32 %v413_v45, %v412_v30 }
 0x290   :  { %v405_v7 = vrot.slane %v404_v1, 2  ;;  %v423_v32 = vrot.slane %v422_v22, 2  ;;  %v442_v49 = vsel %vm269_vm2, %v402_v39, %v441_v44 }
 0x291   :  { %v337_v8 = vpop.permute.xlu1 %336 }
 0x292   :  { %v382_v11 = vmul.f32 %v366_v2, %v337_v8  ;;  %v406_v14 = vadd.f32 %v405_v7, %v404_v1  ;;  %v349_v17 = vperm.slane %v337_v8, %v710_v47  ;;  %v424_v46 = vadd.f32 %v423_v32, %v422_v22 }
 0x294   :  { %v415_v18 = vrot.slane %v382_v11, 4  ;;  %v407_v28 = vrot.slane %v406_v14, 1  ;;  %v356_v29 = vsel %vm275_vm5, %v349_v17, %v355_v26  ;;  %v425_v53 = vrot.slane %v424_v46, 1 }
 0x295   :  { %v357_v40 = vsel %vm277_vm6, %v350_v31, %v356_v29 }
 0x296   :  { %v416_v24 = vadd.f32 %v415_v18, %v382_v11  ;;  %v408_v41 = vadd.f32 %v407_v28, %v406_v14  ;;  %v426_v58 = vadd.f32 %v425_v53, %v424_v46 }
 0x298   :  { %v417_v16 = vrot.slane %v416_v24, 2 }
 0x299   :  { %v343_v35 = vpop.permute.xlu1 %342 }
 0x29a   :  { %v418_v36 = vadd.f32 %v417_v16, %v416_v24  ;;  %v351_v37 = vperm.slane %v343_v35, %v710_v47  ;;  %v384_v38 = vmul.f32 %v368_v27, %v343_v35  ;;  %v443_v47 = vsel %vm271_vm3, %v408_v41, %v442_v49 }
 0x29b   :  { %v444_v55 = vsel %vm273_vm4, %v414_v52, %v443_v47 }
 0x29c   :  { %v419_v33 = vrot.slane %v418_v36, 1  ;;  %v358_v42 = vsel %vm279_vm7, %v351_v37, %v357_v40  ;;  %v427_v43 = vrot.slane %v384_v38, 4 }
 0x29d   :  { %360 = vst.msk [vmem:[#allocation9] sm:$0xff] %vm282_vm8, %v358_v42 }
 0x29e   :  { %v428_v48 = vadd.f32 %v427_v43, %v384_v38  ;;  %v420_v50 = vadd.f32 %v419_v33, %v418_v36 }
 0x2a0   :  { %v429_v51 = vrot.slane %v428_v48, 2  ;;  %v445_v56 = vsel %vm275_vm5, %v420_v50, %v444_v55 }
 0x2a1   :  { %v446_v60 = vsel %vm277_vm6, %v426_v58, %v445_v56 }
 0x2a2   :  { %v430_v54 = vadd.f32 %v429_v51, %v428_v48 }
 0x2a4   :  { %v431_v57 = vrot.slane %v430_v54, 1 }
 0x2a6   :  { %v432_v59 = vadd.f32 %v431_v57, %v430_v54 }
 0x2a8   :  { %v447_v61 = vsel %vm279_vm7, %v432_v59, %v446_v60 }
 0x2a9   :  { %449 = vst [vmem:[#allocation8] sm:$0xff] %v447_v61 }
 0x2aa   :  { %453 = vsyncadd [#allocation5], 96  ;;  %s456_s14 = sshll.u32 %s789_s5, 4  ;;  %s658_s15 = smov [#allocation8]   ;;  %s457_s14 = int_to_ptr.hbm [resolvable:$true] %s456_s14 }
 0x2ab   :  { %s454_s16 = sshll.u32 %s658_s15, 4  ;;  %s659_s17 = smov 32   ;;  %s455_s16 = int_to_ptr.vmem [resolvable:$true] %s454_s16 }
 0x2ac   :  { %s660_s18 = smov 2  }
 0x2ad   :  { %462 = dma.vmem_to_hbm [thread:$0]  %s455_s16, 32, %s457_s14, [#allocation5], %s659_s17, %s659_s17, %s660_s18  }
 0x2ae   :  { %466 = vsyncadd [#allocation10], 96  ;;  %s469_s21 = sshll.u32 %s790_s6, 4  ;;  %s661_s22 = smov [#allocation9]   ;;  %s470_s21 = int_to_ptr.hbm [resolvable:$true] %s469_s21 }
 0x2af   :  { %s467_s23 = sshll.u32 %s661_s22, 4  ;;  %s468_s23 = int_to_ptr.vmem [resolvable:$true] %s467_s23 }
 0x2b0   :  { %475 = dma.vmem_to_hbm [thread:$0]  %s468_s23, 32, %s470_s21, [#allocation10], %s659_s17, %s659_s17, %s660_s18  }
 0x2b1   :  { %646 = dma.done.wait [#allocation5], 128  }
 0x2b2   :  { %647 = vsyncadd [#allocation5], 4294967168 }
 0x2b3   :  { %648 = dma.done.wait [#allocation10], 128  }
 0x2b4   :  { %649 = vsyncadd [#allocation10], 4294967168 }
 0x2b5   :  { %484 = vsyncpa [#allocation4], 1 }
 0x2b6   :  { %485 = vsyncpa [#allocation7], 1 }
 0x2b7   :  { %486 = vsyncpa [#allocation5], 1 }
 0x2b8   :  { %487 = vsyncpa [#allocation10], 1 }

</bundles_post_ra>
